<compile_context>
chip_gen: v7x
topology: tpu7x:2x2x1
jax: 0.10.0
libtpu: 0.0.40
codegen_flags: <defaults>
</compile_context>

<pallas_src>
import math
import numpy as np
import jax
import jax.numpy as jnp
from jax.experimental import pallas as pl
from jax.experimental.pallas import tpu as pltpu


# ----------------------------------------------------------------------------
# Pallas kernel: one 128-row batch tile per grid step.
# ----------------------------------------------------------------------------
def gru_bayes_mlp_kernel(x_ref, h_ref, w1x_ref, w1h_ref, b1_ref, w2_ref, b2_ref,
                         o_ref):
    # First Linear on cat(x, h), computed as two accumulating MXU dots
    # (no in-kernel lane concatenate).  bf16 operands, f32 accumulation.
    a = (jnp.dot(x_ref[...], w1x_ref[...], preferred_element_type=jnp.float32)
         + jnp.dot(h_ref[...], w1h_ref[...], preferred_element_type=jnp.float32)
         + b1_ref[...])                                   # [TM, Dout] f32
    t = jnp.tanh(a)                                       # EUP, f32
    # Second Linear.
    y = (jnp.dot(t.astype(jnp.bfloat16), w2_ref[...],
                 preferred_element_type=jnp.float32)
         + b2_ref[...])                                   # [TM, Dout] f32
    o_ref[...] = y.astype(o_ref.dtype)                    # one lane-dense store


# ----------------------------------------------------------------------------
# Wrapper
# ----------------------------------------------------------------------------
def gru_bayes_mlp_forward(params, input_prep, previous_hidden, *, block_rows=128):
    """y = mlp(cat(input_prep, previous_hidden)); mlp = Linear -> tanh -> Linear."""
    B, Din = input_prep.shape
    Dout = previous_hidden.shape[1]

    # Split + cast weights once (bf16 MXU operands; biases stay f32).
    W1 = params["W1"]                         # [Din + Dout, Dout]
    W1x = W1[:Din].astype(jnp.bfloat16)       # [Din,  Dout]
    W1h = W1[Din:].astype(jnp.bfloat16)       # [Dout, Dout]
    W2b = params["W2"].astype(jnp.bfloat16)   # [Dout, Dout]
    b1 = params["b1"].astype(jnp.float32).reshape(1, Dout)
    b2 = params["b2"].astype(jnp.float32).reshape(1, Dout)

    # bf16 activations (half the HBM/VMEM streaming bytes).
    x = input_prep.astype(jnp.bfloat16)
    h = previous_hidden.astype(jnp.bfloat16)

    # Pad the batch up to a multiple of the 128-row MXU tile.
    num_blocks = int(pl.cdiv(B, block_rows))
    Bp = num_blocks * block_rows
    if Bp != B:
        x = jnp.pad(x, ((0, Bp - B), (0, 0)))
        h = jnp.pad(h, ((0, Bp - B), (0, 0)))

    def full_spec(shape):
        nd = len(shape)
        return pl.BlockSpec(shape, lambda i, _nd=nd: (0,) * _nd)

    out = pl.pallas_call(
        gru_bayes_mlp_kernel,
        out_shape=jax.ShapeDtypeStruct((Bp, Dout), jnp.float32),
        grid=(num_blocks,),
        in_specs=[
            pl.BlockSpec((block_rows, Din), lambda i: (i, 0)),    # x tile
            pl.BlockSpec((block_rows, Dout), lambda i: (i, 0)),   # h tile
            full_spec(W1x.shape),                                 # resident weights
            full_spec(W1h.shape),
            full_spec(b1.shape),
            full_spec(W2b.shape),
            full_spec(b2.shape),
        ],
        out_specs=pl.BlockSpec((block_rows, Dout), lambda i: (i, 0)),
        compiler_params=pltpu.CompilerParams(
            dimension_semantics=("parallel",)),
    )(x, h, W1x, W1h, b1, W2b, b2)

    return out[:B]


# ----------------------------------------------------------------------------
# Pure-JAX f32 reference (faithful to the PyTorch module).
# ----------------------------------------------------------------------------
def ref_forward(params, input_prep, previous_hidden):
    xh = jnp.concatenate([input_prep, previous_hidden], axis=1)
    a = jnp.tanh(xh @ params["W1"] + params["b1"])
    return a @ params["W2"] + params["b2"]


# ----------------------------------------------------------------------------
if __name__ == "__main__":
    INPUT_DIM = 64      # dimension of the processed input
    OUTPUT_DIM = 128    # dimension of the hidden process (multiple of 128 -> lane dense)
    BATCH = 256         # >= 128 so each grid tile fills the MXU rows (perf feedback)

    key = jax.random.PRNGKey(0)
    k = jax.random.split(key, 6)
    s1 = 1.0 / math.sqrt(INPUT_DIM + OUTPUT_DIM)
    s2 = 1.0 / math.sqrt(OUTPUT_DIM)
    params = {
        # Stored pre-transposed ([in, out]); same affine maps as torch.nn.Linear.
        "W1": s1 * jax.random.normal(k[0], (INPUT_DIM + OUTPUT_DIM, OUTPUT_DIM), jnp.float32),
        "b1": s1 * jax.random.normal(k[1], (OUTPUT_DIM,), jnp.float32),
        "W2": s2 * jax.random.normal(k[2], (OUTPUT_DIM, OUTPUT_DIM), jnp.float32),
        "b2": s2 * jax.random.normal(k[3], (OUTPUT_DIM,), jnp.float32),
    }
    input_prep = jax.random.normal(k[4], (BATCH, INPUT_DIM), jnp.float32)
    previous_hidden = jax.random.normal(k[5], (BATCH, OUTPUT_DIM), jnp.float32)

    y = gru_bayes_mlp_forward(params, input_prep, previous_hidden)
    jax.block_until_ready(y)

    y_ref = ref_forward(params, input_prep, previous_hidden)
    # bf16 matmul operands vs f32 reference -> loose tolerance.
    np.testing.assert_allclose(np.asarray(y), np.asarray(y_ref), rtol=5e-2, atol=5e-2)

    print("KERNEL_OK")
</pallas_src>

<mosaic_0001>
module attributes {stable_mosaic.version = 11 : i64} {
  func.func @gru_bayes_mlp_kernel(%arg0: i32, %arg1: memref<128x64xbf16, #tpu.memory_space<vmem>>, %arg2: memref<128x128xbf16, #tpu.memory_space<vmem>>, %arg3: memref<64x128xbf16, #tpu.memory_space<vmem>>, %arg4: memref<128x128xbf16, #tpu.memory_space<vmem>>, %arg5: memref<1x128xf32, #tpu.memory_space<vmem>>, %arg6: memref<128x128xbf16, #tpu.memory_space<vmem>>, %arg7: memref<1x128xf32, #tpu.memory_space<vmem>>, %arg8: memref<128x128xf32, #tpu.memory_space<vmem>>) attributes {dimension_semantics = [#tpu.dimension_semantics<parallel>], iteration_bounds = array<i64: 2>, scalar_prefetch = 0 : i64, scratch_operands = 0 : i64, tpu.core_type = #tpu.core_type<tc>, window_params = [{transform_indices = @transform_0, window_bounds = array<i64: 128, 64>}, {transform_indices = @transform_1, window_bounds = array<i64: 128, 128>}, {pipeline_mode = #tpu.pipeline_mode<synchronous>, transform_indices = @transform_2, window_bounds = array<i64: 64, 128>}, {pipeline_mode = #tpu.pipeline_mode<synchronous>, transform_indices = @transform_3, window_bounds = array<i64: 128, 128>}, {pipeline_mode = #tpu.pipeline_mode<synchronous>, transform_indices = @transform_4, window_bounds = array<i64: 1, 128>}, {pipeline_mode = #tpu.pipeline_mode<synchronous>, transform_indices = @transform_5, window_bounds = array<i64: 128, 128>}, {pipeline_mode = #tpu.pipeline_mode<synchronous>, transform_indices = @transform_6, window_bounds = array<i64: 1, 128>}, {transform_indices = @transform_7, window_bounds = array<i64: 128, 128>}]} {
    %c0 = arith.constant 0 : index
    %c0_0 = arith.constant 0 : index
    %0 = vector.load %arg1[%c0, %c0_0] : memref<128x64xbf16, #tpu.memory_space<vmem>>, vector<128x64xbf16>
    %c0_1 = arith.constant 0 : index
    %c0_2 = arith.constant 0 : index
    %1 = vector.load %arg3[%c0_1, %c0_2] : memref<64x128xbf16, #tpu.memory_space<vmem>>, vector<64x128xbf16>
    %cst = arith.constant dense<0.000000e+00> : vector<128x128xf32>
    %2 = tpu.matmul %0, %1, %cst {dimension_numbers = #tpu.dot_dimension_numbers<[1], [0], [0], [1], [0, 0, 1, 1], [], []>} : vector<128x64xbf16>, vector<64x128xbf16>, vector<128x128xf32> -> vector<128x128xf32>
    %c0_3 = arith.constant 0 : index
    %c0_4 = arith.constant 0 : index
    %3 = vector.load %arg2[%c0_3, %c0_4] : memref<128x128xbf16, #tpu.memory_space<vmem>>, vector<128x128xbf16>
    %c0_5 = arith.constant 0 : index
    %c0_6 = arith.constant 0 : index
    %4 = vector.load %arg4[%c0_5, %c0_6] : memref<128x128xbf16, #tpu.memory_space<vmem>>, vector<128x128xbf16>
    %cst_7 = arith.constant dense<0.000000e+00> : vector<128x128xf32>
    %5 = tpu.matmul %3, %4, %cst_7 {dimension_numbers = #tpu.dot_dimension_numbers<[1], [0], [0], [1], [0, 0, 1, 1], [], []>} : vector<128x128xbf16>, vector<128x128xbf16>, vector<128x128xf32> -> vector<128x128xf32>
    %6 = arith.addf %2, %5 : vector<128x128xf32>
    %c0_8 = arith.constant 0 : index
    %c0_9 = arith.constant 0 : index
    %7 = vector.load %arg5[%c0_8, %c0_9] : memref<1x128xf32, #tpu.memory_space<vmem>>, vector<1x128xf32>
    %8 = vector.broadcast %7 : vector<1x128xf32> to vector<128x128xf32>
    %9 = arith.addf %6, %8 : vector<128x128xf32>
    %10 = math.tanh %9 : vector<128x128xf32>
    %11 = arith.truncf %10 : vector<128x128xf32> to vector<128x128xbf16>
    %c0_10 = arith.constant 0 : index
    %c0_11 = arith.constant 0 : index
    %12 = vector.load %arg6[%c0_10, %c0_11] : memref<128x128xbf16, #tpu.memory_space<vmem>>, vector<128x128xbf16>
    %cst_12 = arith.constant dense<0.000000e+00> : vector<128x128xf32>
    %13 = tpu.matmul %11, %12, %cst_12 {dimension_numbers = #tpu.dot_dimension_numbers<[1], [0], [0], [1], [0, 0, 1, 1], [], []>} : vector<128x128xbf16>, vector<128x128xbf16>, vector<128x128xf32> -> vector<128x128xf32>
    %c0_13 = arith.constant 0 : index
    %c0_14 = arith.constant 0 : index
    %14 = vector.load %arg7[%c0_13, %c0_14] : memref<1x128xf32, #tpu.memory_space<vmem>>, vector<1x128xf32>
    %15 = vector.broadcast %14 : vector<1x128xf32> to vector<128x128xf32>
    %16 = arith.addf %13, %15 : vector<128x128xf32>
    %c0_15 = arith.constant 0 : index
    %c0_16 = arith.constant 0 : index
    %17 = vector.load %arg8[%c0_15, %c0_16] : memref<128x128xf32, #tpu.memory_space<vmem>>, vector<128x128xf32>
    tpu.vector_store %arg8[%c0_15, %c0_16], %16 {strides = array<i32>} : memref<128x128xf32, #tpu.memory_space<vmem>>, vector<128x128xf32>,
    return
  }
  func.func @transform_0(%arg0: i32) -> (i32, i32) {
    %c0_i32 = arith.constant 0 : i32
    %c0_i32_0 = arith.constant 0 : i32
    return %arg0, %c0_i32 : i32, i32
  }
  func.func @transform_1(%arg0: i32) -> (i32, i32) {
    %c0_i32 = arith.constant 0 : i32
    %c0_i32_0 = arith.constant 0 : i32
    return %arg0, %c0_i32 : i32, i32
  }
  func.func @transform_2(%arg0: i32) -> (i32, i32) {
    %c0_i32 = arith.constant 0 : i32
    %c0_i32_0 = arith.constant 0 : i32
    %c0_i32_1 = arith.constant 0 : i32
    return %c0_i32, %c0_i32_0 : i32, i32
  }
  func.func @transform_3(%arg0: i32) -> (i32, i32) {
    %c0_i32 = arith.constant 0 : i32
    %c0_i32_0 = arith.constant 0 : i32
    %c0_i32_1 = arith.constant 0 : i32
    return %c0_i32, %c0_i32_0 : i32, i32
  }
  func.func @transform_4(%arg0: i32) -> (i32, i32) {
    %c0_i32 = arith.constant 0 : i32
    %c0_i32_0 = arith.constant 0 : i32
    %c0_i32_1 = arith.constant 0 : i32
    return %c0_i32, %c0_i32_0 : i32, i32
  }
  func.func @transform_5(%arg0: i32) -> (i32, i32) {
    %c0_i32 = arith.constant 0 : i32
    %c0_i32_0 = arith.constant 0 : i32
    %c0_i32_1 = arith.constant 0 : i32
    return %c0_i32, %c0_i32_0 : i32, i32
  }
  func.func @transform_6(%arg0: i32) -> (i32, i32) {
    %c0_i32 = arith.constant 0 : i32
    %c0_i32_0 = arith.constant 0 : i32
    %c0_i32_1 = arith.constant 0 : i32
    return %c0_i32, %c0_i32_0 : i32, i32
  }
  func.func @transform_7(%arg0: i32) -> (i32, i32) {
    %c0_i32 = arith.constant 0 : i32
    %c0_i32_0 = arith.constant 0 : i32
    return %arg0, %c0_i32 : i32, i32
  }
}

</mosaic_0001>

<bundles_post_ra>
// kernel: tpu_custom_call.1
= control target key start
LH: loop header
LB: loop body
LE: loop exit
PB: predicated region body
PF: predicated region fallthrough
CT: control target
= control target key end

     0   :  { %12 = vsyncpa [#allocation3], 0  ;;  %s1921_s0 = inlined_call_operand.vmem [shape: bf16[256,64], index: 0, kind: input, shape index: {}]   ;;  %s1922_s1 = inlined_call_operand.vmem [shape: bf16[256,128], index: 1, kind: input, shape index: {}]   ;;  %s1923_s2 = inlined_call_operand.hbm [shape: bf16[64,128], index: 2, kind: input, shape index: {}]   ;;  %s1924_s3 = inlined_call_operand.vmem [shape: bf16[128,128], index: 3, kind: input, shape index: {}]   ;;  %s1925_s4 = inlined_call_operand.vmem [shape: f32[1,128], index: 4, kind: input, shape index: {}]   ;;  %s1926_s5 = inlined_call_operand.hbm [shape: bf16[128,128], index: 5, kind: input, shape index: {}]   ;;  %s1927_s6 = inlined_call_operand.vmem [shape: f32[1,128], index: 6, kind: input, shape index: {}]   ;;  %s1928_s7 = inlined_call_operand.hbm [shape: f32[256,128], index: 7, kind: output, shape index: {}]  }
   0x1   :  { %13 = vsyncpa [#allocation6], 0 }
   0x2   :  { %14 = vsyncpa [#allocation4], 0 }
   0x3   :  { %16 = vsyncpa [#allocation4 + $0x1], 0  ;;  %s1645_s24 = smov 0   ;;  %s1647_s25 = smov 0  }
   0x4   :  { %s1649_s26 = smov 0   ;;  %s1651_s27 = smov 0  }
   0x5 LB: > { %s1666_s28 = sadd.s32 4294967295, %s1596_s27   ;;  %s1109_s29 = sadd.s32 4294967294, %s1596_s27   ;;  %s1596_s27 = sphi %s1651_s27, %s1948_s27   ;;  %s1592_s26 = sphi %s1649_s26, %s1947_s26   ;;  %s1588_s25 = sphi %s1647_s25, %s1946_s25   ;;  %s1584_s24 = sphi %s1645_s24, %s1945_s24  }
   0x6   : > { %s1670_s30 = sadd.s32 1, %s1596_s27   ;;  %s186_s8 = sadd.s32 1, %s1592_s26 }
   0x7   : > { %s183_s9 = ssub.s32 %s1596_s27, %s1670_s30  ;;  %p196_p0 = scmp.ne.s32.totalorder %s1592_s26, %s1588_s25 }
   0x8   : > { %p184_p1 = scmp.eq.s32.totalorder %s183_s9, 0  ;;  %p197_p2 = scmp.eq.s32.totalorder %s1666_s28, 1 }
   0x9   : > { %p202_p3 = scmp.ne.s32.totalorder %s1588_s25, %s1584_s24  ;;  %p203_p4 = scmp.eq.s32.totalorder %s1109_s29, 1 }
   0xa   : > { %s1681_s10 = scalar_select %p184_p1, %s1592_s26, %s186_s8  }
   0xb   : > { %p1683_p5 = por %p197_p2, %p196_p0  ;;  %p1687_p6 = por %p203_p4, %p202_p3 }
   0xc   : > { %1932 = sst [smem:[#allocation11_spill]] %s1681_s10  ;;  %p1110_p7 = scmp.ge.s32.totalorder %s1596_s27, 1 }
   0xd   : > { %s1933_s11 = scalar_select %p1683_p5, 1, 0 }
   0xe   : > { %s1934_s12 = scalar_select %p1687_p6, 1, 0 }
   0xf   : > { %p210_p8 = scmp.lt.s32.totalorder %s1596_s27, 3  ;;  %p1929_p9 = scmp.eq.s32.totalorder %s1666_s28, 0 }
  0x10   : > { %s1598_s14 = smov [#allocation2]   ;;  %s1599_s17 = smov [#allocation5]  }
  0x11   : > { %p1694_p10 = pnand %p1110_p7, %p210_p8  ;;  %s222_s15 = sshll.u32 %s1598_s14, 4  ;;  %s223_s15 = int_to_ptr.vmem [resolvable:$true] %s222_s15 }
  0x12   : > { %s241_s18 = sshll.u32 %s1599_s17, 4  ;;  %s1470_s21 = scalar_lea.hbm %s1923_s2, 512  ;;  %s1706_s18 = int_to_ptr.vmem [resolvable:$true] %s241_s18 }
  0x13   : > { %s1935_s13 = scalar_select %p1694_p10, 1, 0 }
  0x14   : > { %p1348_p11 = pneg %p1694_p10  ;;  %p1471_p13 = scmp.ne.s32.totalorder %s1923_s2, %s1470_s21 }
  0x15   : > { %p1477_p3 = scmp.lt.u32.totalorder %s1470_s21, %s1923_s2 }
  0x16   : > { %p1702_p12 = pnand %p1929_p9, %p1348_p11 }
  0x18   : > { %p1472_p0 = pneg %p1702_p12 }
  0x1a   : > { %p1473_p1 = pnand %p1472_p0, %p1471_p13 }
  0x1c   : > { %p1474_p2 = pneg %p1473_p1 }
  0x1e   : > { %p1479_p4 = pnand %p1477_p3, %p1474_p2 }
  0x20   : > { %1482 = shalt.err (!%p1479_p4)
}
  0x21   : > { %s1483_s9 = scalar_lea.vmem %s223_s15, 512  ;;  %p1491_p9 = scmp.lt.s32.totalorder %s223_s15, %s223_s15 }
  0x22   : > { %p1484_p7 = scmp.ne.s32.totalorder %s223_s15, %s1483_s9  ;;  %p1492_p6 = scmp.lt.s32.totalorder %s1483_s9, %s1483_s9 }
  0x24   : > { %p1486_p8 = pnand %p1484_p7, %p1472_p0  ;;  %p1493_p5 = por %p1492_p6, %p1491_p9 }
  0x26   : > { %p1487_p11 = pneg %p1486_p8 }
  0x28   : > { %p1494_p10 = pnand %p1493_p5, %p1487_p11 }
  0x2a   : > { %1497 = shalt.err (!%p1494_p10)
}
  0x2b   : > { %s1600_s14 = smov 64   ;;  %s1601_s17 = smov 4  }
  0x2c   : > { %1351 = dma.hbm_to_vmem [thread:$0]  (!%p1702_p12), %s1923_s2, 512, %s223_s15, [#allocation3], %s1600_s14, %s1600_s14, %s1601_s17  }
  0x2d   : > { %s1498_s23 = scalar_lea.hbm %s1926_s5, 1024 }
  0x2e   : > { %p1499_p13 = scmp.ne.s32.totalorder %s1926_s5, %s1498_s23  ;;  %p1505_p9 = scmp.lt.u32.totalorder %s1498_s23, %s1926_s5 }
  0x30   : > { %p1501_p5 = pnand %p1499_p13, %p1472_p0 }
  0x32   : > { %p1502_p6 = pneg %p1501_p5 }
  0x34   : > { %p1507_p10 = pnand %p1505_p9, %p1502_p6 }
  0x36   : > { %1510 = shalt.err (!%p1507_p10)
}
  0x37   : > { %s1511_s15 = scalar_lea.vmem %s1706_s18, 1024  ;;  %p1519_p4 = scmp.lt.s32.totalorder %s1706_s18, %s1706_s18 }
  0x38   : > { %p1512_p1 = scmp.ne.s32.totalorder %s1706_s18, %s1511_s15  ;;  %p1520_p7 = scmp.lt.s32.totalorder %s1511_s15, %s1511_s15 }
  0x3a   : > { %p1514_p2 = pnand %p1512_p1, %p1472_p0  ;;  %p1521_p8 = por %p1520_p7, %p1519_p4 }
  0x3c   : > { %p1515_p3 = pneg %p1514_p2 }
  0x3e   : > { %p1522_p11 = pnand %p1521_p8, %p1515_p3 }
  0x40   : > { %1525 = shalt.err (!%p1522_p11)
}
  0x41   : > { %1354 = dma.hbm_to_vmem [thread:$0]  (!%p1702_p12), %s1926_s5, 1024, %s1706_s18, [#allocation6], %s1600_s14, %s1600_s14, %s1601_s17  }
  0x42   : > { %p1937_p13 = scmp.ne.s32.totalorder %s1935_s13, 0 }
  0x43   : > { %p1938_p5 = scmp.eq.s32.totalorder (!%p1937_p13), %s1666_s28, 0 }
  0x44   : > { %278 = sbr.rel (%p1937_p13) target bundleno = 602 (0x25a), region = 48 }
  0x4b   : > { %1571 = dma.done.wait (%p1938_p5), [#allocation3], 512   ;;  %p1939_p0 = pmov %p1938_p5 }
  0x4d   : > { %1573 = vsyncadd (%p1939_p0), [#allocation3], 4294966784  ;;  %p1940_p6 = pmov %p1939_p0 }
  0x4e   : > { %p1941_p9 = pmov %p1939_p0 }
  0x4f   : > { %1575 = dma.done.wait (%p1940_p6), [#allocation6], 1024  }
  0x50   : > { %1577 = vsyncadd (%p1941_p9), [#allocation6], 4294966272  ;;  %s1118_s16 = sshll.u32 %s1666_s28, 4  ;;  %v1402_v0 = vld [vmem:[%s1924_s3] sm:$0xff]   ;;  %v1403_v1 = vld [vmem:[%s1924_s3 + $0x8] sm:$0xff]   ;;  %vm646_vm0 = vcmask 523264  }
  0x51   : > { %p320_p10 = scmp.lt.s32.totalorder %s1118_s16, 31  ;;  %1218 = vmatprep.subr.bf16.mxu0 %v1402_v0  ;;  %v1404_v2 = vld [vmem:[%s1924_s3 + $0x10] sm:$0xff]   ;;  %v1406_v3 = vld [vmem:[#allocation2] sm:$0xff]   ;;  %v1408_v4 = vld [vmem:[#allocation2 + $0x8] sm:$0xff]   ;;  %s316_s9 = sand.u32 1, %s1588_s25  }
  0x52   : > { %1219 = vmatpush3.bf16.msra.mxu0 %v1402_v0  ;;  %1250 = vmatprep.subr.bf16.mxu1 %v1406_v3  ;;  %v1405_v5 = vld [vmem:[%s1924_s3 + $0x18] sm:$0xff]   ;;  %v1410_v6 = vld [vmem:[#allocation2 + $0x10] sm:$0xff]   ;;  %v1407_v7 = vld [vmem:[%s1924_s3 + $0x20] sm:$0xff]   ;;  %s1173_s20 = sshll.u32 %s1666_s28, 11  ;;  %s1880_s28 = scalar_lea.sflag [#allocation4], %s316_s9 }
  0x53   : > { %s1950_s16 = smov (!%p320_p10, %s1118_s16), 31  ;;  %1220 = vmatprep.subr.bf16.mxu0 %v1403_v1  ;;  %1251 = vmatpush3.bf16.msra.mxu1 %v1406_v3  ;;  %v1412_v8 = vld [vmem:[#allocation2 + $0x18] sm:$0xff]   ;;  %v1409_v11 = vld [vmem:[%s1924_s3 + $0x28] sm:$0xff]   ;;  %v1411_v14 = vld [vmem:[%s1924_s3 + $0x30] sm:$0xff]   ;;  %s1871_s17 = scalar_lea.hbm %s1928_s7, %s1173_s20 }
  0x54   : > { %s1119_s22 = sshll.u32 %s1950_s16, 2  ;;  %1252 = vmatprep.subr.bf16.mxu1 %v1408_v4  ;;  %v1413_v15 = vld [vmem:[%s1924_s3 + $0x38] sm:$0xff]   ;;  %v1430_v19 = vld [vmem:[#allocation5] sm:$0xff]   ;;  %v1431_v21 = vld [vmem:[#allocation5 + $0x8] sm:$0xff]   ;;  %p1942_p1 = scmp.ne.s32.totalorder %s1933_s11, 0 }
  0x55   : > { %s1781_s15 = scalar_lea.vmem %s1921_s0, %s1119_s22  ;;  %s1789_s18 = scalar_lea.vmem %s1922_s1, %s1119_s22  ;;  %v1432_v30 = vld [vmem:[#allocation5 + $0x10] sm:$0xff]   ;;  %v1433_v31 = vld [vmem:[#allocation5 + $0x18] sm:$0xff]   ;;  %v1434_v32 = vld [vmem:[#allocation5 + $0x20] sm:$0xff]  }
  0x56   : > { %1221 = vmatpush3.bf16.msra.mxu0 %v1403_v1  ;;  %v1414_v9 = vld [vmem:[%s1781_s15] sm:$0xff]   ;;  %v1415_v12 = vld [vmem:[%s1781_s15 + $0x8] sm:$0xff]   ;;  %v1418_v13 = vld [vmem:[%s1781_s15 + $0x10] sm:$0xff]   ;;  %s1602_s22 = smov [#allocation7]  }
  0x57   : > { %1222 = vmatprep.subr.bf16.mxu0 %v1404_v2  ;;  %1253 = vmatpush3.bf16.msra.mxu1 %v1408_v4  ;;  %v1416_v10 = vld [vmem:[%s1789_s18] sm:$0xff]   ;;  %v1419_v16 = vld [vmem:[%s1781_s15 + $0x18] sm:$0xff]   ;;  %v1417_v18 = vld [vmem:[%s1789_s18 + $0x8] sm:$0xff]   ;;  %s1530_s23 = sshll.u32 %s1602_s22, 4  ;;  %s1531_s23 = int_to_ptr.vmem [resolvable:$false] %s1530_s23 }
  0x58   : > { %1254 = vmatprep.subr.bf16.mxu1 %v1410_v6  ;;  %1258 = vmatprep.mubr.msk.bf16.mxu1 %vm646_vm0, %v1414_v9  ;;  %v1422_v17 = vld [vmem:[%s1781_s15 + $0x20] sm:$0xff]   ;;  %v1420_v20 = vld [vmem:[%s1789_s18 + $0x10] sm:$0xff]   ;;  %v1423_v22 = vld [vmem:[%s1781_s15 + $0x28] sm:$0xff]   ;;  %s1532_s29 = scalar_lea.vmem %s1531_s23, 4096 }
  0x59   : > { %1234 = vmatprep.mubr.bf16.mxu0 %v1416_v10  ;;  %v1426_v23 = vld [vmem:[%s1781_s15 + $0x30] sm:$0xff]   ;;  %v1421_v24 = vld [vmem:[%s1789_s18 + $0x18] sm:$0xff]   ;;  %v1424_v25 = vld [vmem:[%s1789_s18 + $0x20] sm:$0xff]  }
  0x5a   : > { %1223 = vmatpush3.bf16.msra.mxu0 %v1404_v2  ;;  %v1427_v26 = vld [vmem:[%s1781_s15 + $0x38] sm:$0xff]   ;;  %v1425_v27 = vld [vmem:[%s1789_s18 + $0x28] sm:$0xff]   ;;  %v1428_v28 = vld [vmem:[%s1789_s18 + $0x30] sm:$0xff]   ;;  %s1117_s15 = sshll.u32 %s316_s9, 7 }
  0x5b   : > { %1224 = vmatprep.subr.bf16.mxu0 %v1405_v5  ;;  %1255 = vmatpush3.bf16.msra.mxu1 %v1410_v6  ;;  %v1429_v29 = vld [vmem:[%s1789_s18 + $0x38] sm:$0xff]   ;;  %v1435_v33 = vld [vmem:[#allocation5 + $0x28] sm:$0xff]   ;;  %v1436_v34 = vld [vmem:[#allocation5 + $0x30] sm:$0xff]   ;;  %s1851_s16 = scalar_lea.vmem [#allocation7], %s1117_s15 }
  0x5c   : > { %1256 = vmatprep.subr.bf16.mxu1 %v1412_v8  ;;  %v1437_v35 = vld [vmem:[#allocation5 + $0x38] sm:$0xff]   ;;  %v1827_v45 = vld [vmem:[%s1925_s4] ss:$0 sm:$0xff]  ;;  %s1013_s18 = sshll.u32 %s1851_s16, 4  ;;  %s1873_s18 = int_to_ptr.vmem [resolvable:$true] %s1013_s18 }
  0x5d   : > { %s1526_s21 = scalar_lea.vmem %s1873_s18, 2048  ;;  %p1533_p4 = scmp.lt.s32.totalorder %s1873_s18, %s1531_s23 }
  0x5e   : > { %1225 = vmatpush3.bf16.msra.mxu0 %v1405_v5  ;;  %p1527_p12 = scmp.ne.s32.totalorder %s1873_s18, %s1526_s21  ;;  %p1534_p7 = scmp.lt.s32.totalorder %s1532_s29, %s1526_s21 }
  0x5f   : > { %1226 = vmatprep.subr.bf16.mxu0 %v1407_v7  ;;  %1257 = vmatpush3.bf16.msra.mxu1 %v1412_v8 }
  0x60   : > { %1306 = vmatprep.subr.bf16.mxu1 %v1430_v19  ;;  %p1528_p2 = pnand %p1527_p12, %p1942_p1  ;;  %p1535_p8 = por %p1534_p7, %p1533_p4 }
  0x62   : > { %1227 = vmatpush3.bf16.msra.mxu0 %v1407_v7  ;;  %1259 = vmatmul.mubr.msk.bf16.vlgmr.msra.gmra.mrb[0].mxu1 %vm646_vm0, %v1415_v12  ;;  %p1529_p3 = pneg %p1528_p2 }
  0x63   : > { %1228 = vmatprep.subr.bf16.mxu0 %v1409_v11  ;;  %1262 = vmatprep.mubr.msk.bf16.mxu1 %vm646_vm0, %v1418_v13 }
  0x64   : > { %1314 = vmatpush3.bf16.msra.mxu1 %v1430_v19  ;;  %p1536_p11 = pnand %p1535_p8, %p1529_p3 }
  0x65   : > { %1307 = vmatprep.subr.bf16.mxu1 %v1431_v21 }
  0x66   : > { %1229 = vmatpush3.bf16.msra.mxu0 %v1409_v11 }
  0x67   : > { %1230 = vmatprep.subr.bf16.mxu0 %v1411_v14 }
  0x68   : > { %1315 = vmatpush3.bf16.msra.mxu1 %v1431_v21 }
  0x69   : > { %1308 = vmatprep.subr.bf16.mxu1 %v1432_v30 }
  0x6a   : > { %1231 = vmatpush3.bf16.msra.mxu0 %v1411_v14  ;;  %1263 = vmatmul.mubr.msk.bf16.gmra.mrb[4].mxu1 %vm646_vm0, %v1419_v16 }
  0x6b   : > { %1232 = vmatprep.subr.bf16.mxu0 %v1413_v15  ;;  %1266 = vmatprep.mubr.msk.bf16.mxu1 %vm646_vm0, %v1422_v17 }
  0x6c   : > { %1316 = vmatpush3.bf16.msra.mxu1 %v1432_v30 }
  0x6d   : > { %1309 = vmatprep.subr.bf16.mxu1 %v1433_v31 }
  0x6e   : > { %1233 = vmatpush3.bf16.msra.mxu0 %v1413_v15 }
  0x6f   : > { %1274 = vmatprep.subr.bf16.mxu0 %v1430_v19 }
  0x70   : > { %1317 = vmatpush3.bf16.msra.mxu1 %v1433_v31 }
  0x71   : > { %1235 = vmatmul.mubr.bf16.vlgmr.msra.gmra.mrb[0].mxu0 %v1417_v18  ;;  %1310 = vmatprep.subr.bf16.mxu1 %v1434_v32 }
  0x72   : > { %1238 = vmatprep.mubr.bf16.mxu0 %v1420_v20  ;;  %1275 = vmatpush3.bf16.msra.mxu0 %v1430_v19 }
  0x73   : > { %1276 = vmatprep.subr.bf16.mxu0 %v1431_v21  ;;  %1267 = vmatmul.mubr.msk.bf16.gmra.mrb[8].mxu1 %vm646_vm0, %v1423_v22 }
  0x74   : > { %1270 = vmatprep.mubr.msk.bf16.mxu1 %vm646_vm0, %v1426_v23  ;;  %1318 = vmatpush3.bf16.msra.mxu1 %v1434_v32 }
  0x75   : > { %1311 = vmatprep.subr.bf16.mxu1 %v1435_v33 }
  0x76   : > { %1277 = vmatpush3.bf16.msra.mxu0 %v1431_v21 }
  0x77   : > { %1278 = vmatprep.subr.bf16.mxu0 %v1432_v30 }
  0x78   : > { %1319 = vmatpush3.bf16.msra.mxu1 %v1435_v33 }
  0x79   : > { %1239 = vmatmul.mubr.bf16.gmra.mrb[4].mxu0 %v1421_v24  ;;  %1312 = vmatprep.subr.bf16.mxu1 %v1436_v34 }
  0x7a   : > { %1242 = vmatprep.mubr.bf16.mxu0 %v1424_v25  ;;  %1279 = vmatpush3.bf16.msra.mxu0 %v1432_v30 }
  0x7b   : > { %1271 = vmatmul.mubr.msk.bf16.gmra.mrb[12].mxu1 %vm646_vm0, %v1427_v26  ;;  %1280 = vmatprep.subr.bf16.mxu0 %v1433_v31 }
  0x7c   : > { %1320 = vmatpush3.bf16.msra.mxu1 %v1436_v34 }
  0x7d   : > { %1313 = vmatprep.subr.bf16.mxu1 %v1437_v35 }
  0x7e   : > { %1281 = vmatpush3.bf16.msra.mxu0 %v1433_v31 }
  0x7f   : > { %1282 = vmatprep.subr.bf16.mxu0 %v1434_v32 }
  0x80   : > { %1321 = vmatpush3.bf16.msra.mxu1 %v1437_v35 }
  0x81   : > { %1243 = vmatmul.mubr.bf16.gmra.mrb[8].mxu0 %v1425_v27 }
  0x82   : > { %1246 = vmatprep.mubr.bf16.mxu0 %v1428_v28  ;;  %1283 = vmatpush3.bf16.msra.mxu0 %v1434_v32 }
  0x83   : > { %1284 = vmatprep.subr.bf16.mxu0 %v1435_v33 }
  0x86   : > { %1285 = vmatpush3.bf16.msra.mxu0 %v1435_v33 }
  0x87   : > { %1286 = vmatprep.subr.bf16.mxu0 %v1436_v34 }
  0x89   : > { %1247 = vmatmul.mubr.bf16.gmra.mrb[12].mxu0 %v1429_v29 }
  0x8a   : > { %1287 = vmatpush3.bf16.msra.mxu0 %v1436_v34 }
  0x8b   : > { %1288 = vmatprep.subr.bf16.mxu0 %v1437_v35 }
  0x8e   : > { %1289 = vmatpush3.bf16.msra.mxu0 %v1437_v35 }
 0x135   : > { %v1260_v36 = vpop.f32.mrb[0].mxu1 }
 0x136   : > { %v705_v37 = vpop.f32.mrb[1].mxu1 }
 0x137   : > { %v1261_v38 = vpop.f32.mrb[2].mxu1 }
 0x138   : > { %v708_v39 = vpop.f32.mrb[3].mxu1 }
 0x13d   : > { %v1264_v40 = vpop.f32.mrb[4].mxu1 }
 0x13e   : > { %v721_v41 = vpop.f32.mrb[5].mxu1 }
 0x13f   : > { %v1265_v42 = vpop.f32.mrb[6].mxu1 }
 0x140   : > { %v724_v43 = vpop.f32.mrb[7].mxu1 }
 0x144   : > { %v1236_v44 = vpop.f32.mrb[0].mxu0 }
 0x145   : > { %v714_v46 = vadd.f32 %v1260_v36, %v1236_v44  ;;  %v519_v47 = vpop.f32.mrb[1].mxu0 }
 0x146   : > { %v706_v48 = vadd.f32 %v705_v37, %v519_v47  ;;  %v1237_v49 = vpop.f32.mrb[2].mxu0  ;;  %v1268_v55 = vpop.f32.mrb[8].mxu1 }
 0x147   : > { %v777_v50 = vadd.f32 %v1827_v45, %v714_v46  ;;  %v717_v51 = vadd.f32 %v1261_v38, %v1237_v49  ;;  %v522_v52 = vpop.f32.mrb[3].mxu0  ;;  %v737_v57 = vpop.f32.mrb[9].mxu1 }
 0x148   : > { %v775_v53 = vadd.f32 %v1827_v45, %v706_v48  ;;  %v709_v54 = vadd.f32 %v708_v39, %v522_v52  ;;  %v1269_v59 = vpop.f32.mrb[10].mxu1 }
 0x149   : > { %1438 = vtanh.f32 %v777_v50  ;;  %v778_v56 = vadd.f32 %v1827_v45, %v717_v51  ;;  %v740_v60 = vpop.f32.mrb[11].mxu1 }
 0x14a   : > { %1440 = vtanh.f32 %v775_v53  ;;  %v776_v58 = vadd.f32 %v1827_v45, %v709_v54 }
 0x14b   : > { %1442 = vtanh.f32 %v778_v56 }
 0x14c   : > { %1444 = vtanh.f32 %v776_v58  ;;  %v1240_v61 = vpop.f32.mrb[4].mxu0 }
 0x14d   : > { %v730_v62 = vadd.f32 %v1264_v40, %v1240_v61  ;;  %v535_v63 = vpop.f32.mrb[5].mxu0 }
 0x14e   : > { %v722_v0 = vadd.f32 %v721_v41, %v535_v63  ;;  %v1241_v1 = vpop.f32.mrb[6].mxu0  ;;  %v1272_v7 = vpop.f32.mrb[12].mxu1 }
 0x14f   : > { %v781_v2 = vadd.f32 %v1827_v45, %v730_v62  ;;  %v733_v3 = vadd.f32 %v1265_v42, %v1241_v1  ;;  %v538_v4 = vpop.f32.mrb[7].mxu0  ;;  %v753_v9 = vpop.f32.mrb[13].mxu1 }
 0x150   : > { %v779_v5 = vadd.f32 %v1827_v45, %v722_v0  ;;  %v725_v6 = vadd.f32 %v724_v43, %v538_v4  ;;  %v1273_v11 = vpop.f32.mrb[14].mxu1 }
 0x151   : > { %1446 = vtanh.f32 %v781_v2  ;;  %v782_v8 = vadd.f32 %v1827_v45, %v733_v3  ;;  %v756_v13 = vpop.f32.mrb[15].mxu1 }
 0x152   : > { %1448 = vtanh.f32 %v779_v5  ;;  %v780_v10 = vadd.f32 %v1827_v45, %v725_v6 }
 0x153   : > { %v1439_v12 = vpop.eup %1438  ;;  %1450 = vtanh.f32 %v782_v8 }
 0x154   : > { %v1441_v14 = vpop.eup %1440  ;;  %1452 = vtanh.f32 %v780_v10  ;;  %v1244_v15 = vpop.f32.mrb[8].mxu0 }
 0x155   : > { %v1443_v16 = vpop.eup %1442  ;;  %v746_v17 = vadd.f32 %v1268_v55, %v1244_v15  ;;  %v551_v18 = vpop.f32.mrb[9].mxu0 }
 0x156   : > { %v1445_v19 = vpop.eup %1444  ;;  %v738_v20 = vadd.f32 %v737_v57, %v551_v18  ;;  %v1245_v21 = vpop.f32.mrb[10].mxu0  ;;  %v808_v22 = vpack.c.bf16 %v1443_v16, %v1439_v12 }
 0x157   : > { %v785_v23 = vadd.f32 %v1827_v45, %v746_v17  ;;  %v749_v24 = vadd.f32 %v1269_v59, %v1245_v21  ;;  %v554_v25 = vpop.f32.mrb[11].mxu0  ;;  %v807_v26 = vpack.c.bf16 %v1445_v19, %v1441_v14 }
 0x158   : > { %v783_v27 = vadd.f32 %v1827_v45, %v738_v20  ;;  %v741_v28 = vadd.f32 %v740_v60, %v554_v25 }
 0x159   : > { %1454 = vtanh.f32 %v785_v23  ;;  %v786_v29 = vadd.f32 %v1827_v45, %v749_v24  ;;  %1290 = vmatprep.mubr.bf16.mxu0 %v807_v26 }
 0x15a   : > { %1456 = vtanh.f32 %v783_v27  ;;  %v784_v30 = vadd.f32 %v1827_v45, %v741_v28  ;;  %1291 = vmatmul.mubr.bf16.vlgmr.msra.gmra.mrb[16].mxu0 %v808_v22 }
 0x15b   : > { %v1447_v31 = vpop.eup %1446  ;;  %1458 = vtanh.f32 %v786_v29 }
 0x15c   : > { %v1449_v32 = vpop.eup %1448  ;;  %1460 = vtanh.f32 %v784_v30  ;;  %v1248_v33 = vpop.f32.mrb[12].mxu0 }
 0x15d   : > { %v1451_v34 = vpop.eup %1450  ;;  %v762_v35 = vadd.f32 %v1272_v7, %v1248_v33  ;;  %v567_v36 = vpop.f32.mrb[13].mxu0 }
 0x15e   : > { %v1453_v37 = vpop.eup %1452  ;;  %v754_v38 = vadd.f32 %v753_v9, %v567_v36  ;;  %v1249_v39 = vpop.f32.mrb[14].mxu0  ;;  %v810_v40 = vpack.c.bf16 %v1451_v34, %v1447_v31 }
 0x15f   : > { %v789_v41 = vadd.f32 %v1827_v45, %v762_v35  ;;  %v765_v42 = vadd.f32 %v1273_v11, %v1249_v39  ;;  %v570_v43 = vpop.f32.mrb[15].mxu0  ;;  %v809_v44 = vpack.c.bf16 %v1453_v37, %v1449_v32 }
 0x160   : > { %v787_v46 = vadd.f32 %v1827_v45, %v754_v38  ;;  %v757_v47 = vadd.f32 %v756_v13, %v570_v43 }
 0x161   : > { %1462 = vtanh.f32 %v789_v41  ;;  %v790_v48 = vadd.f32 %v1827_v45, %v765_v42  ;;  %1294 = vmatprep.mubr.bf16.mxu1 %v809_v44 }
 0x162   : > { %1464 = vtanh.f32 %v787_v46  ;;  %v788_v49 = vadd.f32 %v1827_v45, %v757_v47  ;;  %1295 = vmatmul.mubr.bf16.vlgmr.msra.gmra.mrb[16].mxu1 %v810_v40  ;;  %v1159_v45 = vld [vmem:[%s1927_s6] ss:$0 sm:$0xff] }
 0x163   : > { %v1455_v50 = vpop.eup %1454  ;;  %1466 = vtanh.f32 %v790_v48 }
 0x164   : > { %v1457_v51 = vpop.eup %1456  ;;  %1468 = vtanh.f32 %v788_v49 }
 0x165   : > { %v1459_v52 = vpop.eup %1458 }
 0x166   : > { %v1461_v53 = vpop.eup %1460  ;;  %v812_v54 = vpack.c.bf16 %v1459_v52, %v1455_v50 }
 0x167   : > { %v811_v55 = vpack.c.bf16 %v1461_v53, %v1457_v51 }
 0x169   : > { %1298 = vmatprep.mubr.bf16.mxu1 %v811_v55 }
 0x16a   : > { %1299 = vmatmul.mubr.bf16.gmra.mrb[20].mxu1 %v812_v54 }
 0x16b   : > { %v1463_v56 = vpop.eup %1462 }
 0x16c   : > { %v1465_v57 = vpop.eup %1464 }
 0x16d   : > { %v1467_v58 = vpop.eup %1466 }
 0x16e   : > { %v1469_v59 = vpop.eup %1468  ;;  %v814_v60 = vpack.c.bf16 %v1467_v58, %v1463_v56 }
 0x16f   : > { %v813_v61 = vpack.c.bf16 %v1469_v59, %v1465_v57 }
 0x171   : > { %1302 = vmatprep.mubr.bf16.mxu1 %v813_v61 }
 0x172   : > { %1303 = vmatmul.mubr.bf16.gmra.mrb[24].mxu1 %v814_v60 }
 0x22d   : > { %v1292_v62 = vpop.f32.mrb[16].mxu0 }
 0x22e   : > { %v929_v63 = vadd.f32 %v1292_v62, %v1159_v45  ;;  %v920_v0 = vpop.f32.mrb[17].mxu0 }
 0x22f   : > { %v921_v1 = vadd.f32 %v1159_v45, %v920_v0  ;;  %v1293_v2 = vpop.f32.mrb[18].mxu0 }
 0x230   : > { %985 = vst [vmem:[%s1851_s16 + $0x10] sm:$0xff] %v929_v63  ;;  %v932_v3 = vadd.f32 %v1293_v2, %v1159_v45  ;;  %v923_v4 = vpop.f32.mrb[19].mxu0 }
 0x231   : > { %983 = vst [vmem:[%s1851_s16] sm:$0xff] %v921_v1  ;;  %v924_v5 = vadd.f32 %v1159_v45, %v923_v4 }
 0x232   : > { %986 = vst [vmem:[%s1851_s16 + $0x18] sm:$0xff] %v932_v3 }
 0x233   : > { %984 = vst [vmem:[%s1851_s16 + $0x8] sm:$0xff] %v924_v5 }
 0x235   : > { %v1296_v6 = vpop.f32.mrb[16].mxu1 }
 0x236   : > { %v945_v7 = vadd.f32 %v1296_v6, %v1159_v45  ;;  %v936_v8 = vpop.f32.mrb[17].mxu1 }
 0x237   : > { %v937_v9 = vadd.f32 %v1159_v45, %v936_v8  ;;  %v1297_v10 = vpop.f32.mrb[18].mxu1 }
 0x238   : > { %989 = vst [vmem:[%s1851_s16 + $0x30] sm:$0xff] %v945_v7  ;;  %v948_v11 = vadd.f32 %v1297_v10, %v1159_v45  ;;  %v939_v12 = vpop.f32.mrb[19].mxu1 }
 0x239   : > { %987 = vst [vmem:[%s1851_s16 + $0x20] sm:$0xff] %v937_v9  ;;  %v940_v13 = vadd.f32 %v1159_v45, %v939_v12 }
 0x23a   : > { %990 = vst [vmem:[%s1851_s16 + $0x38] sm:$0xff] %v948_v11 }
 0x23b   : > { %988 = vst [vmem:[%s1851_s16 + $0x28] sm:$0xff] %v940_v13 }
 0x23d   : > { %v1300_v14 = vpop.f32.mrb[20].mxu1 }
 0x23e   : > { %v961_v15 = vadd.f32 %v1300_v14, %v1159_v45  ;;  %v952_v16 = vpop.f32.mrb[21].mxu1 }
 0x23f   : > { %v953_v17 = vadd.f32 %v1159_v45, %v952_v16  ;;  %v1301_v18 = vpop.f32.mrb[22].mxu1 }
 0x240   : > { %993 = vst [vmem:[%s1851_s16 + $0x50] sm:$0xff] %v961_v15  ;;  %v964_v19 = vadd.f32 %v1301_v18, %v1159_v45  ;;  %v955_v20 = vpop.f32.mrb[23].mxu1 }
 0x241   : > { %991 = vst [vmem:[%s1851_s16 + $0x40] sm:$0xff] %v953_v17  ;;  %v956_v21 = vadd.f32 %v1159_v45, %v955_v20 }
 0x242   : > { %994 = vst [vmem:[%s1851_s16 + $0x58] sm:$0xff] %v964_v19 }
 0x243   : > { %992 = vst [vmem:[%s1851_s16 + $0x48] sm:$0xff] %v956_v21 }
 0x245   : > { %v1304_v22 = vpop.f32.mrb[24].mxu1 }
 0x246   : > { %v977_v23 = vadd.f32 %v1304_v22, %v1159_v45  ;;  %v968_v24 = vpop.f32.mrb[25].mxu1 }
 0x247   : > { %v969_v25 = vadd.f32 %v1159_v45, %v968_v24  ;;  %v1305_v26 = vpop.f32.mrb[26].mxu1 }
 0x248   : > { %997 = vst [vmem:[%s1851_s16 + $0x70] sm:$0xff] %v977_v23  ;;  %v980_v27 = vadd.f32 %v1305_v26, %v1159_v45  ;;  %v971_v28 = vpop.f32.mrb[27].mxu1 }
 0x249   : > { %995 = vst [vmem:[%s1851_s16 + $0x60] sm:$0xff] %v969_v25  ;;  %v972_v29 = vadd.f32 %v1159_v45, %v971_v28 }
 0x24a   : > { %998 = vst [vmem:[%s1851_s16 + $0x78] sm:$0xff] %v980_v27 }
 0x24b   : > { %996 = vst [vmem:[%s1851_s16 + $0x68] sm:$0xff] %v972_v29 }
 0x24c   : > { %1539 = shalt.err (!%p1536_p11)
}
 0x24d   : > { %s1540_s8 = scalar_lea.hbm %s1871_s17, 2048  ;;  %s1544_s10 = scalar_lea.hbm %s1928_s7, 4096 }
 0x24e   : > { %p1541_p13 = scmp.ne.s32.totalorder %s1871_s17, %s1540_s8  ;;  %p1545_p6 = scmp.lt.u32.totalorder %s1871_s17, %s1928_s7 }
 0x24f   : > { %p1546_p9 = scmp.lt.u32.totalorder %s1544_s10, %s1540_s8  ;;  %p1548_p12 = scmp.lt.u32.totalorder %s1540_s8, %s1871_s17 }
 0x250   : > { %p1542_p5 = pnand %p1541_p13, %p1942_p1 }
 0x251   : > { %p1547_p10 = por %p1546_p9, %p1545_p6 }
 0x252   : > { %p1543_p0 = pneg %p1542_p5 }
 0x253   : > { %p1549_p2 = por %p1548_p12, %p1547_p10 }
 0x255   : > { %p1550_p3 = pnand %p1549_p2, %p1543_p0 }
 0x257   : > { %1553 = shalt.err (!%p1550_p3)
}
 0x258   : > { %s1603_s20 = smov 128   ;;  %s1604_s13 = smov 8  }
 0x259   : > { %1346 = dma.vmem_to_hbm [thread:$0]  (%p1942_p1), %s1873_s18, 2048, %s1871_s17, %s1880_s28, %s1603_s20, %s1603_s20, %s1604_s13  }
 0x25a PF: > { %p1363_p4 = scmp.ge.s32.totalorder %s1596_s27, 2  ;;  %s1028_s14 = sand.u32 1, %s1584_s24  }
 0x25b   : > { %p1943_p7 = scmp.ne.s32.totalorder %s1934_s12, 0  ;;  %s1029_s21 = scalar_lea.sflag [#allocation4], %s1028_s14 }
 0x25d   : > { %p1356_p8 = pnand %p1363_p4, %p1943_p7 }
 0x25f   : > { %1579 = dma.done.wait (!%p1356_p8), %s1029_s21, 2048  }
 0x260   : > { %1581 = vsyncadd (!%p1356_p8), %s1029_s21, 4294965248  ;;  %s1944_s22 = sld [smem:[#allocation11_spill]]  ;;  %p19_p11 = scmp.ge.s32.totalorder %s1670_s30, 4  }
 0x261   : > { %s1945_s24 = smov %s1588_s25  ;;  %s1946_s25 = smov %s1592_s26 }
 0x262   : > { %s1948_s27 = smov %s1670_s30  ;;  %21 = sbr.rel (!%p19_p11) target bundleno = 5 (0x5), region = 95 }
 0x266   : > { %s1947_s26 = smov %s1944_s22 }
 0x269   :  { %1034 = vsyncpa [#allocation3], 1 }
 0x26a   :  { %1036 = vsyncpa [#allocation3 + $0x1], 1 }
 0x26b   :  { %1037 = vsyncpa [#allocation6], 1 }
 0x26c   :  { %1038 = vsyncpa [#allocation4], 1 }
 0x26d   :  { %1040 = vsyncpa [#allocation4 + $0x1], 1 }

</bundles_post_ra>
